<compile_context>
chip_gen: v7x
topology: tpu7x:2x2x1
jax: 0.10.0
libtpu: 0.0.40
codegen_flags: <defaults>
</compile_context>

<pallas_src>
import functools

import jax
import jax.numpy as jnp
from jax.experimental import pallas as pl
from jax.experimental.pallas import tpu as pltpu


def _round_up(x: int, m: int) -> int:
    return ((x + m - 1) // m) * m


def _cdiv(a: int, b: int) -> int:
    return -(-a // b)


def _choose_tiles(bn: int, block_lanes: int) -> tuple[int, int]:
    """Returns (tb, n_blocks) with tb a multiple of 128 and small padding."""
    bn128 = _round_up(bn, 128)
    max_blocks = bn128 // 128
    # >= ~8 grid steps when the batch allows: keeps the BlockSpec pipeline
    # primed and bounds v7x 2-TensorCore imbalance to <= 1/8.
    n_blocks = min(max(_cdiv(bn128, block_lanes), 8), max_blocks)
    tb = _round_up(_cdiv(bn128, n_blocks), 128)
    tb = min(tb, _round_up(block_lanes, 128))
    n_blocks = _cdiv(bn128, tb)
    return tb, n_blocks


# ---------------------------------------------------------------------------
# Kernel body. c_ref: (6, TB) rows l00,l10,l11,l20,l21,l22 (batch on lanes).
# q_ref: (9, TB) rows Q00,Q01,Q02,Q10,...,Q22   (unique_only=False), or
#        (6, TB) rows Q00,Q10,Q11,Q20,Q21,Q22   (unique_only=True, same
#        lower-triangular order as the input).
# ---------------------------------------------------------------------------
def _cov_kernel(c_ref, q_ref, *, unique_only: bool):
    l00 = c_ref[pl.ds(0, 1), :]
    l10 = c_ref[pl.ds(1, 1), :]
    l11 = c_ref[pl.ds(2, 1), :]
    l20 = c_ref[pl.ds(3, 1), :]
    l21 = c_ref[pl.ds(4, 1), :]
    l22 = c_ref[pl.ds(5, 1), :]

    # Q[a, b] = sum_k L[a, k] * L[b, k]   (L lower triangular)
    q00 = l00 * l00
    q01 = l00 * l10
    q02 = l00 * l20
    q11 = l10 * l10 + l11 * l11
    q12 = l10 * l20 + l11 * l21
    q22 = l20 * l20 + l21 * l21 + l22 * l22

    if unique_only:
        # Fits a single 8-sublane vreg tile; one coalesced store.
        q_ref[...] = jnp.concatenate([q00, q01, q11, q02, q12, q22], axis=0)
    else:
        # Three 3-row group stores: avoids materializing a (9, TB) concat temp
        # while keeping the store count far below the v5e vst-slot budget.
        q_ref[pl.ds(0, 3), :] = jnp.concatenate([q00, q01, q02], axis=0)
        q_ref[pl.ds(3, 3), :] = jnp.concatenate([q01, q11, q12], axis=0)
        q_ref[pl.ds(6, 3), :] = jnp.concatenate([q02, q12, q22], axis=0)


def _cov_from_chol_jnp(c: jax.Array) -> jax.Array:
    """Fused single-pass fallback for the PyTorch-layout output."""
    bn = c.shape[0]
    l00, l10, l11, l20, l21, l22 = (c[:, k] for k in range(6))
    q00 = l00 * l00
    q01 = l00 * l10
    q02 = l00 * l20
    q11 = l10 * l10 + l11 * l11
    q12 = l10 * l20 + l11 * l21
    q22 = l20 * l20 + l21 * l21 + l22 * l22
    q = jnp.stack([q00, q01, q02, q01, q11, q12, q02, q12, q22], axis=-1)
    return q.reshape(bn, 3, 3)


@functools.partial(
    jax.jit, static_argnames=("block_lanes", "unique_only", "input_lane_major")
)
def _pallas_cov_lane_major(chol_cov, *, block_lanes, unique_only, input_lane_major):
    """Returns Q in lane-dense layout: (9, bn) or (6, bn) float32."""
    if input_lane_major:
        assert chol_cov.shape[0] == 6
        bn = chol_cov.shape[1]
    else:
        assert chol_cov.shape[1] == 6
        bn = chol_cov.shape[0]

    tb, n_blocks = _choose_tiles(bn, block_lanes)
    bn_pad = tb * n_blocks

    c = jnp.asarray(chol_cov, jnp.float32)
    if input_lane_major:
        if bn_pad != bn:
            c = jnp.pad(c, ((0, 0), (0, bn_pad - bn)))
        c_t = c                                      # already (6, bn_pad)
    else:
        if bn_pad != bn:
            c = jnp.pad(c, ((0, bn_pad - bn), (0, 0)))
        c_t = c.T                                    # (6, bn_pad)

    n_out_rows = 6 if unique_only else 9
    cost = pl.CostEstimate(
        flops=13 * bn_pad,
        transcendentals=0,
        bytes_accessed=4 * (6 + n_out_rows) * bn_pad,
    )

    q_flat = pl.pallas_call(
        functools.partial(_cov_kernel, unique_only=unique_only),
        out_shape=jax.ShapeDtypeStruct((n_out_rows, bn_pad), jnp.float32),
        grid=(n_blocks,),
        in_specs=[pl.BlockSpec((6, tb), lambda i: (0, i))],
        out_specs=pl.BlockSpec((n_out_rows, tb), lambda i: (0, i)),
        compiler_params=pltpu.CompilerParams(
            dimension_semantics=("parallel",),   # shard grid across TCs (v7x)
            allow_input_fusion=[True],           # let XLA fuse pad/transpose in
            vmem_limit_bytes=32 * 1024 * 1024,
        ),
        cost_estimate=cost,
    )(c_t)

    if bn_pad != bn:
        q_flat = q_flat[:, :bn]
    return q_flat


def get_cov_mat_from_chol(
    chol_cov: jax.Array,
    *,
    lane_major: bool = False,
    unique_only: bool = False,
    input_lane_major: bool = False,
    block_lanes: int = 65536,
    use_pallas: bool | None = None,
) -> jax.Array:
    """chol_cov -> Q = L @ L^T.

    Default: input (bn, 6), output (bn, 3, 3) float32 (PyTorch convention),
    computed by a fused single-pass jnp epilogue (no extra HBM transposes).
    lane_major=True: lane-dense output (9, bn), or (6, bn) unique entries with
    unique_only=True, produced by the Pallas kernel (default when bn >= 1024).
    input_lane_major=True: accept a (6, bn) input directly.
    """
    if input_lane_major:
        assert chol_cov.shape[0] == 6
        bn = chol_cov.shape[1]
    else:
        assert chol_cov.shape[1] == 6
        bn = chol_cov.shape[0]

    if use_pallas is None:
        # The Pallas path only wins when the lane-dense slab is consumed
        # directly; for (bn,3,3) output the fused jnp path is a single pass.
        use_pallas = lane_major and bn >= 1024

    if not use_pallas:
        c = jnp.asarray(chol_cov, jnp.float32)
        if input_lane_major:
            c = c.T
        q = _cov_from_chol_jnp(c)                    # (bn, 3, 3)
        if not lane_major:
            return q
        q_flat = q.reshape(bn, 9).T                  # (9, bn)
        if unique_only:
            return q_flat[jnp.array([0, 3, 4, 6, 7, 8])]
        return q_flat

    q_flat = _pallas_cov_lane_major(
        chol_cov,
        block_lanes=block_lanes,
        unique_only=unique_only,
        input_lane_major=input_lane_major,
    )
    if lane_major:
        return q_flat

    # Caller explicitly asked for the kernel but needs the PyTorch layout:
    # one extra transpose pass (documented cost).
    if unique_only:
        q00, q10, q11, q20, q21, q22 = (q_flat[r] for r in range(6))
        q = jnp.stack([q00, q10, q20, q10, q11, q21, q20, q21, q22], axis=-1)
        return q.reshape(bn, 3, 3)
    return q_flat.T.reshape(bn, 3, 3)


def _reference(chol_cov: jax.Array) -> jax.Array:
    bn = chol_cov.shape[0]
    c = jnp.asarray(chol_cov, jnp.float32)
    L = jnp.zeros((bn, 3, 3), jnp.float32)
    idx = 0
    for j in range(3):
        for i in range(j + 1):
            L = L.at[:, j, i].set(c[:, idx])
            idx += 1
    return jnp.matmul(L, jnp.swapaxes(L, 1, 2))


if __name__ == "__main__":
    root = jax.random.PRNGKey(0)
    k1, k2, k3 = jax.random.split(root, 3)

    # 1) Pallas kernel (explicit opt-in), PyTorch-convention output, 8-step grid.
    bn1 = 2048
    x1 = jax.random.normal(k1, (bn1, 6), dtype=jnp.float32)
    q1 = jax.block_until_ready(get_cov_mat_from_chol(x1, use_pallas=True))
    assert q1.shape == (bn1, 3, 3) and q1.dtype == jnp.float32
    assert jnp.allclose(q1, _reference(x1), atol=1e-5, rtol=1e-5)

    # 2) Pallas kernel, lane-major unique-entry output, ragged bn (padding path).
    bn2 = 300
    x2 = jax.random.normal(k2, (bn2, 6), dtype=jnp.float32)
    ref2 = _reference(x2)
    q2u = jax.block_until_ready(
        get_cov_mat_from_chol(x2, lane_major=True, unique_only=True, use_pallas=True)
    )
    assert q2u.shape == (6, bn2)
    for r, (a, b) in enumerate([(0, 0), (1, 0), (1, 1), (2, 0), (2, 1), (2, 2)]):
        assert jnp.allclose(q2u[r], ref2[:, a, b], atol=1e-5, rtol=1e-5)

    # 2b) Lane-major input (6, bn) -> lane-major full (9, bn) output.
    q2f = jax.block_until_ready(
        get_cov_mat_from_chol(
            x2.T, lane_major=True, input_lane_major=True, use_pallas=True
        )
    )
    assert q2f.shape == (9, bn2)
    assert jnp.allclose(q2f.T.reshape(bn2, 3, 3), ref2, atol=1e-5, rtol=1e-5)

    # 3) Default PyTorch-layout path -> fused single-pass jnp (no Pallas launch).
    bn3 = 8
    x3 = jax.random.normal(k3, (bn3, 6), dtype=jnp.float32)
    q3 = jax.block_until_ready(get_cov_mat_from_chol(x3))
    assert q3.shape == (bn3, 3, 3)
    assert jnp.allclose(q3, _reference(x3), atol=1e-5, rtol=1e-5)

    print("KERNEL_OK")
</pallas_src>

<mosaic_0001>
module attributes {stable_mosaic.version = 11 : i64} {
  func.func @_cov_kernel(%arg0: i32, %arg1: memref<6x256xf32, #tpu.memory_space<vmem>>, %arg2: memref<9x256xf32, #tpu.memory_space<vmem>>) attributes {dimension_semantics = [#tpu.dimension_semantics<parallel>], iteration_bounds = array<i64: 8>, scalar_prefetch = 0 : i64, scratch_operands = 0 : i64, tpu.core_type = #tpu.core_type<tc>, window_params = [{transform_indices = @transform_0, window_bounds = array<i64: 6, 256>}, {transform_indices = @transform_1, window_bounds = array<i64: 9, 256>}]} {
    %c0 = arith.constant 0 : index
    %c0_0 = arith.constant 0 : index
    %0 = vector.load %arg1[%c0, %c0_0] : memref<6x256xf32, #tpu.memory_space<vmem>>, vector<1x256xf32>
    %c1 = arith.constant 1 : index
    %c0_1 = arith.constant 0 : index
    %1 = vector.load %arg1[%c1, %c0_1] : memref<6x256xf32, #tpu.memory_space<vmem>>, vector<1x256xf32>
    %c2 = arith.constant 2 : index
    %c0_2 = arith.constant 0 : index
    %2 = vector.load %arg1[%c2, %c0_2] : memref<6x256xf32, #tpu.memory_space<vmem>>, vector<1x256xf32>
    %c3 = arith.constant 3 : index
    %c0_3 = arith.constant 0 : index
    %3 = vector.load %arg1[%c3, %c0_3] : memref<6x256xf32, #tpu.memory_space<vmem>>, vector<1x256xf32>
    %c4 = arith.constant 4 : index
    %c0_4 = arith.constant 0 : index
    %4 = vector.load %arg1[%c4, %c0_4] : memref<6x256xf32, #tpu.memory_space<vmem>>, vector<1x256xf32>
    %c5 = arith.constant 5 : index
    %c0_5 = arith.constant 0 : index
    %5 = vector.load %arg1[%c5, %c0_5] : memref<6x256xf32, #tpu.memory_space<vmem>>, vector<1x256xf32>
    %6 = arith.mulf %0, %0 : vector<1x256xf32>
    %7 = arith.mulf %0, %1 : vector<1x256xf32>
    %8 = arith.mulf %0, %3 : vector<1x256xf32>
    %9 = arith.mulf %1, %1 : vector<1x256xf32>
    %10 = arith.mulf %2, %2 : vector<1x256xf32>
    %11 = arith.addf %9, %10 : vector<1x256xf32>
    %12 = arith.mulf %1, %3 : vector<1x256xf32>
    %13 = arith.mulf %2, %4 : vector<1x256xf32>
    %14 = arith.addf %12, %13 : vector<1x256xf32>
    %15 = arith.mulf %3, %3 : vector<1x256xf32>
    %16 = arith.mulf %4, %4 : vector<1x256xf32>
    %17 = arith.addf %15, %16 : vector<1x256xf32>
    %18 = arith.mulf %5, %5 : vector<1x256xf32>
    %19 = arith.addf %17, %18 : vector<1x256xf32>
    %20 = tpu.concatenate %6, %7, %8 in 0 : vector<1x256xf32>, vector<1x256xf32>, vector<1x256xf32> -> vector<3x256xf32>
    %c0_6 = arith.constant 0 : index
    %c0_7 = arith.constant 0 : index
    %21 = vector.load %arg2[%c0_6, %c0_7] : memref<9x256xf32, #tpu.memory_space<vmem>>, vector<3x256xf32>
    tpu.vector_store %arg2[%c0_6, %c0_7], %20 {strides = array<i32>} : memref<9x256xf32, #tpu.memory_space<vmem>>, vector<3x256xf32>,
    %22 = tpu.concatenate %7, %11, %14 in 0 : vector<1x256xf32>, vector<1x256xf32>, vector<1x256xf32> -> vector<3x256xf32>
    %c3_8 = arith.constant 3 : index
    %c0_9 = arith.constant 0 : index
    %23 = vector.load %arg2[%c3_8, %c0_9] : memref<9x256xf32, #tpu.memory_space<vmem>>, vector<3x256xf32>
    tpu.vector_store %arg2[%c3_8, %c0_9], %22 {strides = array<i32>} : memref<9x256xf32, #tpu.memory_space<vmem>>, vector<3x256xf32>,
    %24 = tpu.concatenate %8, %14, %19 in 0 : vector<1x256xf32>, vector<1x256xf32>, vector<1x256xf32> -> vector<3x256xf32>
    %c6 = arith.constant 6 : index
    %c0_10 = arith.constant 0 : index
    %25 = vector.load %arg2[%c6, %c0_10] : memref<9x256xf32, #tpu.memory_space<vmem>>, vector<3x256xf32>
    tpu.vector_store %arg2[%c6, %c0_10], %24 {strides = array<i32>} : memref<9x256xf32, #tpu.memory_space<vmem>>, vector<3x256xf32>,
    return
  }
  func.func @transform_0(%arg0: i32) -> (i32, i32) {
    %c0_i32 = arith.constant 0 : i32
    %c0_i32_0 = arith.constant 0 : i32
    return %c0_i32, %arg0 : i32, i32
  }
  func.func @transform_1(%arg0: i32) -> (i32, i32) {
    %c0_i32 = arith.constant 0 : i32
    %c0_i32_0 = arith.constant 0 : i32
    return %c0_i32, %arg0 : i32, i32
  }
}

</mosaic_0001>

<bundles_post_ra>
// kernel: _pallas_cov_lane_major.2
= control target key start
LH: loop header
LB: loop body
LE: loop exit
PB: predicated region body
PF: predicated region fallthrough
CT: control target
= control target key end

     0   :  { %6 = vsyncpa [#allocation3], 0  ;;  %s582_s0 = inlined_call_operand.vmem [shape: f32[2048,6], index: 0, kind: input, shape index: {}]   ;;  %s583_s1 = inlined_call_operand.hbm [shape: f32[9,2048], index: 1, kind: output, shape index: {}]  }
   0x1   :  { %8 = vsyncpa [#allocation3 + $0x1], 0  ;;  %s461_s6 = smov 0   ;;  %s463_s7 = smov 0  }
   0x2   :  { %s465_s8 = smov 0   ;;  %s467_s9 = smov 0  }
   0x3 LB: > { %s482_s10 = sadd.s32 4294967295, %s445_s9   ;;  %s327_s11 = sadd.s32 4294967294, %s445_s9   ;;  %s445_s9 = sphi %s467_s9, %s589_s9   ;;  %s441_s8 = sphi %s465_s8, %s588_s8   ;;  %s437_s7 = sphi %s463_s7, %s587_s7   ;;  %s433_s6 = sphi %s461_s6, %s586_s6  }
   0x4   : > { %s486_s12 = sadd.s32 1, %s445_s9   ;;  %s47_s13 = sadd.s32 1, %s441_s8 }
   0x5   : > { %s44_s14 = ssub.s32 %s445_s9, %s486_s12  ;;  %p57_p0 = scmp.ne.s32.totalorder %s441_s8, %s437_s7 }
   0x6   : > { %p45_p1 = scmp.eq.s32.totalorder %s44_s14, 0  ;;  %p58_p2 = scmp.eq.s32.totalorder %s482_s10, 7 }
   0x7   : > { %p63_p3 = scmp.ne.s32.totalorder %s437_s7, %s433_s6  ;;  %p64_p4 = scmp.eq.s32.totalorder %s327_s11, 7 }
   0x8   : > { %s497_s15 = scalar_select %p45_p1, %s441_s8, %s47_s13  }
   0x9   : > { %p499_p5 = por %p58_p2, %p57_p0  ;;  %p503_p6 = por %p64_p4, %p63_p3 }
   0xa   : > { %p330_p7 = scmp.ge.s32.totalorder %s445_s9, 1  ;;  %p91_p8 = scmp.lt.s32.totalorder %s445_s9, 9 }
   0xc   : > { %p92_p9 = pnand %p330_p7, %p91_p8 }
   0xe   : > { %95 = sbr.rel (%p92_p9) target bundleno = 65 (0x41), region = 24 }
  0x15   : > { %s332_s18 = sshll.u32 %s482_s10, 1  ;;  %v152_v0 = vlaneseq  ;;  %s108_s23 = sand.u32 1, %s437_s7   ;;  %vm184_vm0 = vcmask 1040384   ;;  %vm187_vm1 = vcmask 1041408  }
  0x16   : > { %p112_p10 = scmp.lt.s32.totalorder %s332_s18, 15  ;;  %s516_s24 = sshll.u32 %s108_s23, 5 }
  0x17   : > { %v153_v3 = vshrl.u32 %v152_v0, 7  ;;  %s340_s25 = sshll.u32 %s482_s10, 8  ;;  %s110_s26 = scalar_lea.vmem [#allocation2], %s516_s24 }
  0x18   : > { %s591_s18 = smov (!%p112_p10, %s332_s18), 15  ;;  %s265_s27 = sshll.u32 %s110_s26, 4  ;;  %s537_s27 = int_to_ptr.vmem [resolvable:$true] %s265_s27 }
  0x19   : > { %s333_s19 = sshll.u32 %s591_s18, 3  ;;  %v154_v4 = vsub.s32 0, %v153_v3  ;;  %v158_v5 = vsub.s32 1, %v153_v3  ;;  %s533_s30 = scalar_lea.hbm %s583_s1, %s340_s25 }
  0x1a   : > { %s115_s22 = scalar_lea.vmem %s582_s0, %s333_s19  ;;  %s541_s2 = scalar_lea.sflag [#allocation3], %s108_s23 }
  0x1b   : > { %v118_v1 = vld [vmem:[%s115_s22] sm:$0x3f]  ;;  %v334_v2 = vld [vmem:[%s115_s22 + $0x8] sm:$0x3f]  ;;  %s383_s3 = scalar_lea.vmem %s537_s27, 512  ;;  %s447_s4 = smov [#allocation2]  }
  0x1c   : > { %120 = vst [vmem:[#allocation4] sm:$0xff] %v118_v1  ;;  %125 = vst [vmem:[#allocation4 + $0x8] sm:$0xff] %v334_v2  ;;  %p384_p11 = scmp.ne.s32.totalorder %s537_s27, %s383_s3  ;;  %s387_s5 = sshll.u32 %s447_s4, 4  ;;  %s388_s5 = int_to_ptr.vmem [resolvable:$false] %s387_s5 }
  0x1d   : > { %s389_s10 = scalar_lea.vmem %s388_s5, 1024  ;;  %p390_p0 = scmp.lt.s32.totalorder %s537_s27, %s388_s5 }
  0x1e   : > { %p385_p12 = pnand %p384_p11, %p499_p5  ;;  %p391_p1 = scmp.lt.s32.totalorder %s389_s10, %s383_s3 }
  0x20   : > { %p386_p13 = pneg %p385_p12  ;;  %p392_p2 = por %p391_p1, %p390_p0 }
  0x22   : > { %p393_p3 = pnand %p392_p2, %p386_p13 }
  0x23   : > { %v126_v6 = vld [vmem:[#allocation4] ss:$8 sm:$0x3]  ;;  %v128_v7 = vld [vmem:[#allocation4 + $0x1] ss:$8 sm:$0x3] }
  0x24   : > { %v130_v8 = vld [vmem:[#allocation4 + $0x2] ss:$8 sm:$0x3]  ;;  %v132_v9 = vld [vmem:[#allocation4 + $0x3] ss:$8 sm:$0x3]  ;;  %v137_v10 = vmul.f32 %v126_v6, %v126_v6  ;;  %v138_v11 = vmul.f32 %v128_v7, %v126_v6  ;;  %v140_v12 = vmul.f32 %v128_v7, %v128_v7 }
  0x25   : > { %v134_v13 = vld [vmem:[#allocation4 + $0x4] ss:$8 sm:$0x3]  ;;  %v136_v14 = vld [vmem:[#allocation4 + $0x5] ss:$8 sm:$0x3]  ;;  %v139_v15 = vmul.f32 %v132_v9, %v126_v6  ;;  %v141_v16 = vmul.f32 %v130_v8, %v130_v8  ;;  %v143_v17 = vmul.f32 %v132_v9, %v128_v7  ;;  %v146_v18 = vmul.f32 %v132_v9, %v132_v9 }
  0x26   : > { %v144_v19 = vmul.f32 %v134_v13, %v130_v8  ;;  %v147_v20 = vmul.f32 %v134_v13, %v134_v13  ;;  %v149_v21 = vmul.f32 %v136_v14, %v136_v14  ;;  %v155_v22 = vrot.slane %v137_v10, %v154_v4 }
  0x27   : > { %v142_v23 = vadd.f32 %v141_v16, %v140_v12  ;;  %v159_v24 = vrot.slane %v137_v10, %v158_v5  ;;  %v166_v25 = vrot.slane %v138_v11, %v154_v4  ;;  %v170_v26 = vrot.slane %v138_v11, %v158_v5 }
  0x28   : > { %v145_v27 = vadd.f32 %v144_v19, %v143_v17  ;;  %v148_v28 = vadd.f32 %v147_v20, %v146_v18  ;;  %v177_v29 = vrot.slane %v139_v15, %v154_v4  ;;  %v181_v30 = vrot.slane %v139_v15, %v158_v5 }
  0x29   : > { %v185_v31 = vsel %vm184_vm0, %v155_v22, %v166_v25  ;;  %v186_v32 = vsel %vm184_vm0, %v159_v24, %v170_v26  ;;  %v196_v33 = vrot.slane %v142_v23, %v154_v4  ;;  %v200_v34 = vrot.slane %v142_v23, %v158_v5 }
  0x2a   : > { %v150_v35 = vadd.f32 %v149_v21, %v148_v28  ;;  %v188_v36 = vsel %vm187_vm1, %v185_v31, %v177_v29  ;;  %v189_v37 = vsel %vm187_vm1, %v186_v32, %v181_v30  ;;  %v207_v38 = vrot.slane %v145_v27, %v154_v4 }
  0x2b   : > { %190 = vst [vmem:[%s110_s26] sm:$0x7] %v188_v36  ;;  %191 = vst [vmem:[%s110_s26 + $0x8] sm:$0x7] %v189_v37  ;;  %v211_v39 = vrot.slane %v145_v27, %v158_v5  ;;  %v214_v40 = vsel %vm184_vm0, %v166_v25, %v196_v33  ;;  %v215_v41 = vsel %vm184_vm0, %v170_v26, %v200_v34 }
  0x2c   : > { %v216_v42 = vsel %vm187_vm1, %v214_v40, %v207_v38  ;;  %v230_v43 = vrot.slane %v150_v35, %v154_v4  ;;  %v234_v44 = vrot.slane %v150_v35, %v158_v5  ;;  %v237_v45 = vsel %vm184_vm0, %v177_v29, %v207_v38 }
  0x2d   : > { %v217_v46 = vsel %vm187_vm1, %v215_v41, %v211_v39  ;;  %v220_v47 = vrot.slane %v216_v42, 5  ;;  %v238_v48 = vsel %vm184_vm0, %v181_v30, %v211_v39 }
  0x2e   : > { %v221_v49 = vrot.slane %v217_v46, 5  ;;  %v239_v50 = vsel %vm187_vm1, %v237_v45, %v230_v43  ;;  %v240_v51 = vsel %vm187_vm1, %v238_v48, %v234_v44 }
  0x2f   : > { %224 = vst [vmem:[%s110_s26] sm:$0x38] %v220_v47  ;;  %v243_v52 = vrot.slane %v239_v50, 2  ;;  %v244_v53 = vrot.slane %v240_v51, 2 }
  0x30   : > { %225 = vst [vmem:[%s110_s26 + $0x8] sm:$0x38] %v221_v49 }
  0x31   : > { %247 = vst [vmem:[%s110_s26 + $0x10] ss:$-12 sps:$4 sm:$0xc1] %v243_v52   ;;  %248 = vst [vmem:[%s110_s26 + $0x18] ss:$-12 sps:$4 sm:$0xc1] %v244_v53  }
  0x32   : > { %396 = shalt.err (!%p393_p3)
}
  0x33   : > { %s397_s11 = scalar_lea.hbm %s533_s30, 512  ;;  %s401_s18 = scalar_lea.hbm %s583_s1, 4096 }
  0x34   : > { %p398_p4 = scmp.ne.s32.totalorder %s533_s30, %s397_s11  ;;  %p402_p9 = scmp.lt.u32.totalorder %s533_s30, %s583_s1 }
  0x35   : > { %p403_p10 = scmp.lt.u32.totalorder %s401_s18, %s397_s11  ;;  %p405_p12 = scmp.lt.u32.totalorder %s397_s11, %s533_s30 }
  0x36   : > { %p399_p7 = pnand %p398_p4, %p499_p5 }
  0x37   : > { %p404_p11 = por %p403_p10, %p402_p9 }
  0x38   : > { %p400_p8 = pneg %p399_p7 }
  0x39   : > { %p406_p13 = por %p405_p12, %p404_p11 }
  0x3b   : > { %p407_p0 = pnand %p406_p13, %p400_p8 }
  0x3d   : > { %410 = shalt.err (!%p407_p0)
}
  0x3e   : > { %s448_s21 = smov 256   ;;  %s449_s22 = smov 2048  }
  0x3f   : > { %s450_s23 = smov 16  }
  0x40   : > { %341 = dma.vmem_to_hbm [thread:$0]  (%p499_p5), %s537_s27, 512, %s533_s30, %s541_s2, %s448_s21, %s449_s22, %s450_s23  }
  0x41 PF: > { %p347_p1 = scmp.ge.s32.totalorder %s445_s9, 2  ;;  %s280_s24 = sand.u32 1, %s433_s6  }
  0x42   : > { %s281_s25 = scalar_lea.sflag [#allocation3], %s280_s24 }
  0x43   : > { %p344_p2 = pnand %p347_p1, %p503_p6 }
  0x45   : > { %428 = dma.done.wait (!%p344_p2), %s281_s25, 512  }
  0x46   : > { %430 = vsyncadd (!%p344_p2), %s281_s25, 4294966784  ;;  %p11_p3 = scmp.ge.s32.totalorder %s486_s12, 10   ;;  %s586_s6 = smov %s437_s7 }
  0x47   : > { %s587_s7 = smov %s441_s8  ;;  %s588_s8 = smov %s497_s15 }
  0x48   : > { %s589_s9 = smov %s486_s12  ;;  %13 = sbr.rel (!%p11_p3) target bundleno = 3 (0x3), region = 66 }
  0x4f   :  { %286 = vsyncpa [#allocation3], 1 }
  0x50   :  { %288 = vsyncpa [#allocation3 + $0x1], 1 }

</bundles_post_ra>
